<compile_context>
chip_gen: v5e
topology: v5e:2x2
jax: 0.10.0
libtpu: 0.0.40
codegen_flags: <defaults>
</compile_context>

<pallas_src>
import functools

import jax
import jax.numpy as jnp
import numpy as np
from jax import lax
from jax.experimental import pallas as pl
from jax.experimental.pallas import tpu as pltpu


# ----------------------------------------------------------------------------
# Batch-invariant precompute (runs once in the wrapper, plain JAX)
# ----------------------------------------------------------------------------
def _make_coords(H, W, with_r):
    """(ncoord, H, W) f32 coordinate channels, matching AddCoordinates."""
    y = 2.0 * jnp.arange(H, dtype=jnp.float32)[:, None] / (H - 1.0) - 1.0
    y = jnp.broadcast_to(y, (H, W))
    x = 2.0 * jnp.arange(W, dtype=jnp.float32)[None, :] / (W - 1.0) - 1.0
    x = jnp.broadcast_to(x, (H, W))
    chans = [y, x]
    if with_r:
        r = jnp.sqrt(y * y + x * x)
        r = r / jnp.max(r)
        chans.append(r)
    return jnp.stack(chans, axis=0)


def _make_tap_masks(H, W, KH, KW):
    """(KH*KW, H, W) f32 {0,1} masks: 1 where the (dy,dx)-shifted pixel is in-bounds."""
    ph, pw = (KH - 1) // 2, (KW - 1) // 2
    hi = jnp.arange(H, dtype=jnp.int32)[:, None]
    wi = jnp.arange(W, dtype=jnp.int32)[None, :]
    rows = []
    for kh in range(KH):
        dy = kh - ph
        for kw in range(KW):
            dx = kw - pw
            ok = ((hi + dy >= 0) & (hi + dy < H) &
                  (wi + dx >= 0) & (wi + dx < W))
            rows.append(jnp.broadcast_to(ok, (H, W)))
    return jnp.stack(rows, axis=0).astype(jnp.float32)


# ----------------------------------------------------------------------------
# Kernel: one batch element per grid step
# ----------------------------------------------------------------------------
def _coordconv_kernel(coords_ref, masks_ref, x_ref, w_ref, b_ref, o_ref, *,
                      H, W, KH, KW, Cin, ncoord, Ct_pad):
    """
    coords_ref: (ncoord, H*W) f32   resident coordinate channels (y, x[, r])
    masks_ref : (KH*KW, H*W) f32    resident per-tap in-bounds masks
    x_ref     : (Cin, H*W)   bf16   flattened NCHW input (batch dim squeezed)
    w_ref     : (Cout, KH*KW*Ct_pad) bf16  tap-major / channel-minor weights
    b_ref     : (Cout, 1)    f32    bias
    o_ref     : (Cout, H*W)  f32    flattened NCHW 'same'-conv output
    """
    HW = H * W
    ph, pw = (KH - 1) // 2, (KW - 1) // 2
    pad_rows = Ct_pad - (Cin + ncoord)

    parts = [coords_ref[...], x_ref[...].astype(jnp.float32)]
    if pad_rows:
        parts.append(jnp.zeros((pad_rows, HW), jnp.float32))
    full = jnp.concatenate(parts, axis=0)                  # (Ct_pad, HW) f32

    masks = masks_ref[...]                                 # (KH*KW, HW) f32

    # im2col via lane rotation + mask.  A rotation of the flat axis by
    # -(dy*W + dx) realises the (dy, dx) spatial shift for every in-bounds
    # position; wrapped / out-of-bounds positions are exactly the ones the
    # precomputed mask zeroes out.
    taps = []
    t = 0
    for kh in range(KH):
        dy = kh - ph
        for kw in range(KW):
            dx = kw - pw
            off = dy * W + dx
            if off == 0:
                taps.append(full.astype(jnp.bfloat16))
            else:
                rolled = pltpu.roll(full, shift=(-off) % HW, axis=1)
                taps.append((rolled * masks[t:t + 1, :]).astype(jnp.bfloat16))
            t += 1
    patches = jnp.concatenate(taps, axis=0)                # (KH*KW*Ct_pad, HW) bf16

    # Single MXU matmul (bf16 operands, f32 accumulation) + fused bias;
    # lane-dense (Cout, HW) store.
    acc = jnp.dot(w_ref[...], patches, preferred_element_type=jnp.float32)
    acc = acc + b_ref[...]
    o_ref[...] = acc.astype(o_ref.dtype)


# ----------------------------------------------------------------------------
# Wrapper
# ----------------------------------------------------------------------------
def coord_conv_forward(x_nchw, weight, bias, *, padding=1, with_r=False):
    """CoordConv.forward: prepend (y, x[, r]) coordinate channels, then Conv2d.

    x_nchw : (N, Cin, H, W)
    weight : (Cout, Cin + ncoord, KH, KW)   torch Conv2d layout; the coordinate
             channels come first on the input-channel axis (AddCoordinates).
    bias   : (Cout,)
    """
    N, Cin, H, W = x_nchw.shape
    Cout, Ct, KH, KW = weight.shape
    ncoord = 3 if with_r else 2
    assert Ct == Cin + ncoord, (Ct, Cin, ncoord)
    assert KH % 2 == 1 and KW % 2 == 1, "odd kernel sizes only"
    assert H > 1 and W > 1, "coordinate normalisation divides by (H-1)/(W-1)"
    ph, pw = (KH - 1) // 2, (KW - 1) // 2
    assert 0 <= padding <= min(ph, pw), "padding must be in [0, (k-1)//2]"

    HW = H * W
    Ct_pad = -(-Ct // 8) * 8                       # sublane-aligned channel count
    Ktot = KH * KW * Ct_pad

    # Batch-invariant inputs, DMA'd once and VMEM-resident across the grid.
    coords = _make_coords(H, W, with_r).reshape(ncoord, HW)        # f32
    masks = _make_tap_masks(H, W, KH, KW).reshape(KH * KW, HW)     # f32

    # bf16 activations / weights (halved HBM traffic), f32 bias.
    x_flat = x_nchw.reshape(N, Cin, HW).astype(jnp.bfloat16)       # free reshape
    # Tap-major / channel-minor weight matrix matching the kernel's im2col:
    #   Wmat[o, (kh*KW + kw)*Ct_pad + c] = weight[o, c, kh, kw]  (0 for c >= Ct)
    w_tap = jnp.transpose(weight, (0, 2, 3, 1)).astype(jnp.float32)
    if Ct_pad != Ct:
        w_tap = jnp.pad(w_tap, ((0, 0), (0, 0), (0, 0), (0, Ct_pad - Ct)))
    w_mat = w_tap.reshape(Cout, Ktot).astype(jnp.bfloat16)
    b_col = bias.reshape(Cout, 1).astype(jnp.float32)

    kern = functools.partial(_coordconv_kernel, H=H, W=W, KH=KH, KW=KW,
                             Cin=Cin, ncoord=ncoord, Ct_pad=Ct_pad)

    # Rough per-step VMEM footprint (resident inputs + taps/patches + acc).
    step_bytes = ((ncoord + KH * KW) * HW * 4          # coords + masks (f32)
                  + Cin * HW * 2 + Ct_pad * HW * 4     # x block (bf16) + full (f32)
                  + 2 * Ktot * HW * 2                  # taps + patches (bf16)
                  + Cout * Ktot * 2                    # weight matrix (bf16)
                  + 2 * Cout * HW * 4)                 # f32 acc + output block
    vmem_limit = int(min(64 * 2**20, max(32 * 2**20, 2 * step_bytes)))

    cost = pl.CostEstimate(
        flops=2 * N * Cout * Ktot * HW,
        transcendentals=0,
        bytes_accessed=(x_flat.size * 2 + w_mat.size * 2 + coords.size * 4
                        + masks.size * 4 + b_col.size * 4 + N * Cout * HW * 4))

    out_flat = pl.pallas_call(
        kern,
        out_shape=jax.ShapeDtypeStruct((N, Cout, HW), jnp.float32),
        grid=(N,),
        in_specs=[
            pl.BlockSpec((ncoord, HW), lambda n: (0, 0)),       # coords (resident)
            pl.BlockSpec((KH * KW, HW), lambda n: (0, 0)),      # masks  (resident)
            pl.BlockSpec((None, Cin, HW), lambda n: (n, 0, 0)),  # x (per batch)
            pl.BlockSpec((Cout, Ktot), lambda n: (0, 0)),       # weights
            pl.BlockSpec((Cout, 1), lambda n: (0, 0)),          # bias
        ],
        out_specs=pl.BlockSpec((None, Cout, HW), lambda n: (n, 0, 0)),
        compiler_params=pltpu.CompilerParams(
            dimension_semantics=("parallel",),
            vmem_limit_bytes=vmem_limit),
        cost_estimate=cost,
    )(coords, masks, x_flat, w_mat, b_col)

    out = out_flat.reshape(N, Cout, H, W)          # free contiguous reshape
    ch, cw = ph - padding, pw - padding
    if ch or cw:                                   # padding < (k-1)//2 -> crop
        out = out[:, :, ch:H - ch, cw:W - cw]
    return out


# ----------------------------------------------------------------------------
# Plain-JAX references (mirror AddCoordinates + nn.Conv2d) for correctness
# ----------------------------------------------------------------------------
def coordconv_reference(x_nchw, weight, bias, *, padding=1, with_r=False,
                        quantize_bf16=False):
    N, Cin, H, W = x_nchw.shape
    coords = _make_coords(H, W, with_r)
    x_f = x_nchw.astype(jnp.float32)
    w_f = weight.astype(jnp.float32)
    if quantize_bf16:   # emulate the kernel's bf16 operand rounding exactly
        coords = coords.astype(jnp.bfloat16).astype(jnp.float32)
        x_f = x_f.astype(jnp.bfloat16).astype(jnp.float32)
        w_f = w_f.astype(jnp.bfloat16).astype(jnp.float32)
    coords = jnp.broadcast_to(coords[None], (N,) + coords.shape)
    xin = jnp.concatenate([coords, x_f], axis=1)
    out = lax.conv_general_dilated(
        xin, w_f, window_strides=(1, 1),
        padding=((padding, padding), (padding, padding)),
        dimension_numbers=("NCHW", "OIHW", "NCHW"),
        precision=lax.Precision.HIGHEST)
    return out + bias[None, :, None, None].astype(jnp.float32)


if __name__ == "__main__":
    key = jax.random.PRNGKey(0)
    kx, kw1, kb1, kw2, kb2 = jax.random.split(key, 5)

    N, Cin, H, W = 2, 4, 16, 16
    Cout, K = 8, 3
    x = jax.random.normal(kx, (N, Cin, H, W), jnp.float32)

    # CoordConv(4, 8, 3, padding=1, with_r=True): conv sees 4+3 input channels
    w_r = 0.1 * jax.random.normal(kw1, (Cout, Cin + 3, K, K), jnp.float32)
    b_r = 0.1 * jax.random.normal(kb1, (Cout,), jnp.float32)

    out = jax.block_until_ready(
        coord_conv_forward(x, w_r, b_r, padding=1, with_r=True))
    ref_q = coordconv_reference(x, w_r, b_r, padding=1, with_r=True,
                                quantize_bf16=True)
    ref_f = coordconv_reference(x, w_r, b_r, padding=1, with_r=True)
    assert out.shape == ref_f.shape == (N, Cout, H, W), (out.shape, ref_f.shape)
    # structural correctness (bf16-quantized reference): tight tolerance
    np.testing.assert_allclose(np.asarray(out), np.asarray(ref_q),
                               rtol=1e-4, atol=1e-4)
    # semantic closeness to the full-f32 module forward: bf16-level tolerance
    np.testing.assert_allclose(np.asarray(out), np.asarray(ref_f),
                               rtol=2e-2, atol=2e-2)

    # padding=0 (nn.Conv2d default inside CoordConv) -> cropped 'same' output
    out0 = jax.block_until_ready(
        coord_conv_forward(x, w_r, b_r, padding=0, with_r=True))
    ref0 = coordconv_reference(x, w_r, b_r, padding=0, with_r=True,
                               quantize_bf16=True)
    assert out0.shape == ref0.shape == (N, Cout, H - 2, W - 2), out0.shape
    np.testing.assert_allclose(np.asarray(out0), np.asarray(ref0),
                               rtol=1e-4, atol=1e-4)

    # with_r=False variant (conv sees 4+2 input channels)
    w_nr = 0.1 * jax.random.normal(kw2, (Cout, Cin + 2, K, K), jnp.float32)
    b_nr = 0.1 * jax.random.normal(kb2, (Cout,), jnp.float32)
    out_nr = jax.block_until_ready(
        coord_conv_forward(x, w_nr, b_nr, padding=1, with_r=False))
    ref_nr_q = coordconv_reference(x, w_nr, b_nr, padding=1, with_r=False,
                                   quantize_bf16=True)
    ref_nr_f = coordconv_reference(x, w_nr, b_nr, padding=1, with_r=False)
    assert out_nr.shape == ref_nr_f.shape == (N, Cout, H, W)
    np.testing.assert_allclose(np.asarray(out_nr), np.asarray(ref_nr_q),
                               rtol=1e-4, atol=1e-4)
    np.testing.assert_allclose(np.asarray(out_nr), np.asarray(ref_nr_f),
                               rtol=2e-2, atol=2e-2)

    print("KERNEL_OK")
</pallas_src>

<mosaic_0001>
module attributes {stable_mosaic.version = 11 : i64} {
  func.func @_coordconv_kernel(%arg0: i32, %arg1: memref<3x256xf32, #tpu.memory_space<vmem>>, %arg2: memref<9x256xf32, #tpu.memory_space<vmem>>, %arg3: memref<1x4x256xbf16, #tpu.memory_space<vmem>>, %arg4: memref<8x72xbf16, #tpu.memory_space<vmem>>, %arg5: memref<8x1xf32, #tpu.memory_space<vmem>>, %arg6: memref<1x8x256xf32, #tpu.memory_space<vmem>>) attributes {dimension_semantics = [#tpu.dimension_semantics<parallel>], iteration_bounds = array<i64: 2>, scalar_prefetch = 0 : i64, scratch_operands = 0 : i64, tpu.core_type = #tpu.core_type<tc>, window_params = [{pipeline_mode = #tpu.pipeline_mode<synchronous>, transform_indices = @transform_0, window_bounds = array<i64: 3, 256>}, {pipeline_mode = #tpu.pipeline_mode<synchronous>, transform_indices = @transform_1, window_bounds = array<i64: 9, 256>}, {transform_indices = @transform_2, window_bounds = array<i64: 1, 4, 256>}, {pipeline_mode = #tpu.pipeline_mode<synchronous>, transform_indices = @transform_3, window_bounds = array<i64: 8, 72>}, {pipeline_mode = #tpu.pipeline_mode<synchronous>, transform_indices = @transform_4, window_bounds = array<i64: 8, 1>}, {transform_indices = @transform_5, window_bounds = array<i64: 1, 8, 256>}]} {
    %c0 = arith.constant 0 : index
    %c0_0 = arith.constant 0 : index
    %0 = vector.load %arg1[%c0, %c0_0] : memref<3x256xf32, #tpu.memory_space<vmem>>, vector<3x256xf32>
    %c0_1 = arith.constant 0 : index
    %c0_2 = arith.constant 0 : index
    %c0_3 = arith.constant 0 : index
    %1 = vector.load %arg3[%c0_1, %c0_2, %c0_3] : memref<1x4x256xbf16, #tpu.memory_space<vmem>>, vector<1x4x256xbf16>
    %2 = vector.shape_cast %1 : vector<1x4x256xbf16> to vector<4x256xbf16>
    %3 = arith.extf %2 : vector<4x256xbf16> to vector<4x256xf32>
    %cst = arith.constant 0.000000e+00 : f32
    %4 = vector.broadcast %cst : f32 to vector<1x256xf32>
    %5 = tpu.concatenate %0, %3, %4 in 0 : vector<3x256xf32>, vector<4x256xf32>, vector<1x256xf32> -> vector<8x256xf32>
    %c0_4 = arith.constant 0 : index
    %c0_5 = arith.constant 0 : index
    %6 = vector.load %arg2[%c0_4, %c0_5] : memref<9x256xf32, #tpu.memory_space<vmem>>, vector<9x256xf32>
    %c17_i32 = arith.constant 17 : i32
    %7 = tpu.dynamic_rotate %5 by %c17_i32 dim 1 : vector<8x256xf32>, i32 -> vector<8x256xf32>
    %8 = vector.extract_strided_slice %6 {offsets = [0, 0], sizes = [1, 256], strides = [1, 1]} : vector<9x256xf32> to vector<1x256xf32>
    %9 = vector.broadcast %8 : vector<1x256xf32> to vector<8x256xf32>
    %10 = arith.mulf %7, %9 : vector<8x256xf32>
    %11 = arith.truncf %10 : vector<8x256xf32> to vector<8x256xbf16>
    %c16_i32 = arith.constant 16 : i32
    %12 = tpu.dynamic_rotate %5 by %c16_i32 dim 1 : vector<8x256xf32>, i32 -> vector<8x256xf32>
    %13 = vector.extract_strided_slice %6 {offsets = [1, 0], sizes = [1, 256], strides = [1, 1]} : vector<9x256xf32> to vector<1x256xf32>
    %14 = vector.broadcast %13 : vector<1x256xf32> to vector<8x256xf32>
    %15 = arith.mulf %12, %14 : vector<8x256xf32>
    %16 = arith.truncf %15 : vector<8x256xf32> to vector<8x256xbf16>
    %c15_i32 = arith.constant 15 : i32
    %17 = tpu.dynamic_rotate %5 by %c15_i32 dim 1 : vector<8x256xf32>, i32 -> vector<8x256xf32>
    %18 = vector.extract_strided_slice %6 {offsets = [2, 0], sizes = [1, 256], strides = [1, 1]} : vector<9x256xf32> to vector<1x256xf32>
    %19 = vector.broadcast %18 : vector<1x256xf32> to vector<8x256xf32>
    %20 = arith.mulf %17, %19 : vector<8x256xf32>
    %21 = arith.truncf %20 : vector<8x256xf32> to vector<8x256xbf16>
    %c1_i32 = arith.constant 1 : i32
    %22 = tpu.dynamic_rotate %5 by %c1_i32 dim 1 : vector<8x256xf32>, i32 -> vector<8x256xf32>
    %23 = vector.extract_strided_slice %6 {offsets = [3, 0], sizes = [1, 256], strides = [1, 1]} : vector<9x256xf32> to vector<1x256xf32>
    %24 = vector.broadcast %23 : vector<1x256xf32> to vector<8x256xf32>
    %25 = arith.mulf %22, %24 : vector<8x256xf32>
    %26 = arith.truncf %25 : vector<8x256xf32> to vector<8x256xbf16>
    %27 = arith.truncf %5 : vector<8x256xf32> to vector<8x256xbf16>
    %c255_i32 = arith.constant 255 : i32
    %28 = tpu.dynamic_rotate %5 by %c255_i32 dim 1 : vector<8x256xf32>, i32 -> vector<8x256xf32>
    %29 = vector.extract_strided_slice %6 {offsets = [5, 0], sizes = [1, 256], strides = [1, 1]} : vector<9x256xf32> to vector<1x256xf32>
    %30 = vector.broadcast %29 : vector<1x256xf32> to vector<8x256xf32>
    %31 = arith.mulf %28, %30 : vector<8x256xf32>
    %32 = arith.truncf %31 : vector<8x256xf32> to vector<8x256xbf16>
    %c241_i32 = arith.constant 241 : i32
    %33 = tpu.dynamic_rotate %5 by %c241_i32 dim 1 : vector<8x256xf32>, i32 -> vector<8x256xf32>
    %34 = vector.extract_strided_slice %6 {offsets = [6, 0], sizes = [1, 256], strides = [1, 1]} : vector<9x256xf32> to vector<1x256xf32>
    %35 = vector.broadcast %34 : vector<1x256xf32> to vector<8x256xf32>
    %36 = arith.mulf %33, %35 : vector<8x256xf32>
    %37 = arith.truncf %36 : vector<8x256xf32> to vector<8x256xbf16>
    %c240_i32 = arith.constant 240 : i32
    %38 = tpu.dynamic_rotate %5 by %c240_i32 dim 1 : vector<8x256xf32>, i32 -> vector<8x256xf32>
    %39 = vector.extract_strided_slice %6 {offsets = [7, 0], sizes = [1, 256], strides = [1, 1]} : vector<9x256xf32> to vector<1x256xf32>
    %40 = vector.broadcast %39 : vector<1x256xf32> to vector<8x256xf32>
    %41 = arith.mulf %38, %40 : vector<8x256xf32>
    %42 = arith.truncf %41 : vector<8x256xf32> to vector<8x256xbf16>
    %c239_i32 = arith.constant 239 : i32
    %43 = tpu.dynamic_rotate %5 by %c239_i32 dim 1 : vector<8x256xf32>, i32 -> vector<8x256xf32>
    %44 = vector.extract_strided_slice %6 {offsets = [8, 0], sizes = [1, 256], strides = [1, 1]} : vector<9x256xf32> to vector<1x256xf32>
    %45 = vector.broadcast %44 : vector<1x256xf32> to vector<8x256xf32>
    %46 = arith.mulf %43, %45 : vector<8x256xf32>
    %47 = arith.truncf %46 : vector<8x256xf32> to vector<8x256xbf16>
    %48 = tpu.concatenate %11, %16, %21, %26, %27, %32, %37, %42, %47 in 0 : vector<8x256xbf16>, vector<8x256xbf16>, vector<8x256xbf16>, vector<8x256xbf16>, vector<8x256xbf16>, vector<8x256xbf16>, vector<8x256xbf16>, vector<8x256xbf16>, vector<8x256xbf16> -> vector<72x256xbf16>
    %c0_6 = arith.constant 0 : index
    %c0_7 = arith.constant 0 : index
    %49 = vector.load %arg4[%c0_6, %c0_7] : memref<8x72xbf16, #tpu.memory_space<vmem>>, vector<8x72xbf16>
    %cst_8 = arith.constant dense<0.000000e+00> : vector<8x256xf32>
    %50 = tpu.matmul %49, %48, %cst_8 {dimension_numbers = #tpu.dot_dimension_numbers<[1], [0], [0], [1], [0, 0, 1, 1], [], []>} : vector<8x72xbf16>, vector<72x256xbf16>, vector<8x256xf32> -> vector<8x256xf32>
    %c0_9 = arith.constant 0 : index
    %c0_10 = arith.constant 0 : index
    %51 = vector.load %arg5[%c0_9, %c0_10] : memref<8x1xf32, #tpu.memory_space<vmem>>, vector<8x1xf32>
    %52 = vector.broadcast %51 : vector<8x1xf32> to vector<8x256xf32>
    %53 = arith.addf %50, %52 : vector<8x256xf32>
    %c0_11 = arith.constant 0 : index
    %c0_12 = arith.constant 0 : index
    %c0_13 = arith.constant 0 : index
    %54 = vector.load %arg6[%c0_11, %c0_12, %c0_13] : memref<1x8x256xf32, #tpu.memory_space<vmem>>, vector<1x8x256xf32>
    %55 = vector.shape_cast %54 : vector<1x8x256xf32> to vector<8x256xf32>
    %56 = vector.shape_cast %53 : vector<8x256xf32> to vector<1x8x256xf32>
    tpu.vector_store %arg6[%c0_11, %c0_12, %c0_13], %56 {strides = array<i32>} : memref<1x8x256xf32, #tpu.memory_space<vmem>>, vector<1x8x256xf32>,
    return
  }
  func.func @transform_0(%arg0: i32) -> (i32, i32) {
    %c0_i32 = arith.constant 0 : i32
    %c0_i32_0 = arith.constant 0 : i32
    %c0_i32_1 = arith.constant 0 : i32
    return %c0_i32, %c0_i32_0 : i32, i32
  }
  func.func @transform_1(%arg0: i32) -> (i32, i32) {
    %c0_i32 = arith.constant 0 : i32
    %c0_i32_0 = arith.constant 0 : i32
    %c0_i32_1 = arith.constant 0 : i32
    return %c0_i32, %c0_i32_0 : i32, i32
  }
  func.func @transform_2(%arg0: i32) -> (i32, i32, i32) {
    %c0_i32 = arith.constant 0 : i32
    %c0_i32_0 = arith.constant 0 : i32
    %c0_i32_1 = arith.constant 0 : i32
    return %arg0, %c0_i32, %c0_i32_0 : i32, i32, i32
  }
  func.func @transform_3(%arg0: i32) -> (i32, i32) {
    %c0_i32 = arith.constant 0 : i32
    %c0_i32_0 = arith.constant 0 : i32
    %c0_i32_1 = arith.constant 0 : i32
    return %c0_i32, %c0_i32_0 : i32, i32
  }
  func.func @transform_4(%arg0: i32) -> (i32, i32) {
    %c0_i32 = arith.constant 0 : i32
    %c0_i32_0 = arith.constant 0 : i32
    %c0_i32_1 = arith.constant 0 : i32
    return %c0_i32, %c0_i32_0 : i32, i32
  }
  func.func @transform_5(%arg0: i32) -> (i32, i32, i32) {
    %c0_i32 = arith.constant 0 : i32
    %c0_i32_0 = arith.constant 0 : i32
    %c0_i32_1 = arith.constant 0 : i32
    return %arg0, %c0_i32, %c0_i32_0 : i32, i32, i32
  }
}

</mosaic_0001>

<bundles_post_ra>
// kernel: tpu_custom_call.1
= control target key start
LH: loop header
LB: loop body
LE: loop exit
PB: predicated region body
PF: predicated region fallthrough
CT: control target
= control target key end

     0   :  { %10 = vsyncpa [#allocation3], 0  ;;  %s1170_s0 = inlined_call_operand.vmem [shape: f32[3,256], index: 0, kind: input, shape index: {}]   ;;  %s1171_s1 = inlined_call_operand.hbm [shape: f32[9,256], index: 1, kind: input, shape index: {}]   ;;  %s1172_s2 = inlined_call_operand.hbm [shape: bf16[2,4,256], index: 2, kind: input, shape index: {}]   ;;  %s1173_s3 = inlined_call_operand.hbm [shape: bf16[8,72], index: 3, kind: input, shape index: {}]   ;;  %s1174_s4 = inlined_call_operand.vmem [shape: f32[8,1], index: 4, kind: input, shape index: {}]   ;;  %s1175_s5 = inlined_call_operand.hbm [shape: f32[2,8,256], index: 5, kind: output, shape index: {}]  }
   0x1   :  { %11 = vsyncpa [#allocation6], 0 }
   0x2   :  { %13 = vsyncpa [#allocation6 + $0x1], 0 }
   0x3   :  { %14 = vsyncpa [#allocation4], 0 }
   0x4   :  { %16 = vsyncpa [#allocation4 + $0x1], 0  ;;  %s945_s18 = smov 0   ;;  %s947_s19 = smov 0  }
   0x5   :  { %s949_s20 = smov 0   ;;  %s951_s21 = smov 0  }
   0x6 LB: > { %s966_s22 = sadd.s32 4294967295, %s900_s21   ;;  %s632_s23 = sadd.s32 4294967294, %s900_s21   ;;  %s900_s21 = sphi %s951_s21, %s1185_s21   ;;  %s896_s20 = sphi %s949_s20, %s1184_s20   ;;  %s892_s19 = sphi %s947_s19, %s1183_s19   ;;  %s888_s18 = sphi %s945_s18, %s1182_s18  }
   0x7   : > { %p84_p0 = scmp.ne.s32.totalorder %s892_s19, %s888_s18  ;;  %p85_p1 = scmp.eq.s32.totalorder %s966_s22, 0 }
   0x8   : > { %p150_p2 = scmp.eq.s32.totalorder %s966_s22, 1  ;;  %p156_p3 = scmp.eq.s32.totalorder %s632_s23, 1 }
   0x9   : > { %p975_p4 = por %p85_p1, %p84_p0  ;;  %p633_p5 = scmp.ge.s32.totalorder %s900_s21, 1 }
   0xa   : > { %p980_p6 = por %p156_p3, %p84_p0  ;;  %p163_p7 = scmp.lt.s32.totalorder %s900_s21, 3 }
   0xb   : > { %s192_s28 = sshll.u32 %s1173_s3, 4  ;;  %s902_s30 = smov [#allocation7]   ;;  %s193_s28 = int_to_ptr.hbm [resolvable:$true] %s192_s28 }
   0xc   : > { %p988_p8 = pnand %p633_p5, %p163_p7  ;;  %s194_s6 = sshll.u32 %s902_s30, 4  ;;  %s195_s6 = int_to_ptr.vmem [resolvable:$true] %s194_s6 }
   0xd   : > { %s177_s9 = sshll.u32 %s1171_s1, 4  ;;  %s903_s10 = smov [#allocation2]   ;;  %s178_s9 = int_to_ptr.hbm [resolvable:$true] %s177_s9 }
   0xe   : > { %p666_p10 = pneg %p988_p8  ;;  %s179_s11 = sshll.u32 %s903_s10, 4  ;;  %s180_s11 = int_to_ptr.vmem [resolvable:$true] %s179_s11 }
   0xf   : > { %s904_s12 = smov 256   ;;  %s905_s13 = smov 16  }
  0x10   : > { %p667_p11 = pnand %p666_p10, %p85_p1  ;;  %s1001_s14 = sadd.s32 1, %s900_s21  }
  0x11   : > { %s68_s15 = ssub.s32 %s900_s21, %s1001_s14  ;;  %s71_s16 = sadd.s32 1, %s896_s20 }
  0x12   : > { %672 = dma.hbm_to_vmem [thread:$0]  (!%p667_p11), %s193_s28, 64, %s195_s6, [#allocation6]  }
  0x13   : > { %669 = dma.hbm_to_vmem [thread:$0]  (!%p667_p11), %s178_s9, 512, %s180_s11, [#allocation3], %s904_s12, %s904_s12, %s905_s13  }
  0x14   : > { %p69_p12 = scmp.eq.s32.totalorder %s68_s15, 0  ;;  %p78_p13 = scmp.ne.s32.totalorder %s896_s20, %s892_s19 }
  0x15   : > { %p79_p0 = scmp.eq.s32.totalorder %s900_s21, 0  ;;  %p683_p7 = scmp.lt.s32.totalorder %s900_s21, 2 }
  0x16   : > { %s1010_s17 = scalar_select %p69_p12, %s896_s20, %s71_s16  }
  0x17   : > { %p1014_p3 = por %p150_p2, %p78_p13  ;;  %p80_p5 = por %p79_p0, %p78_p13 }
  0x18   : > { %s208_s26 = sand.u32 1, %s900_s21   ;;  %s210_s27 = sand.u32 1, %s896_s20  }
  0x19   : > { %s637_s28 = sshll.u32 %s210_s27, 2  ;;  %s652_s30 = sshll.u32 %s900_s21, 2 }
  0x1a   : > { %s217_s8 = scalar_lea.hbm %s1172_s2, %s652_s30  ;;  %s212_s10 = scalar_lea.vmem [#allocation5], %s637_s28 }
  0x1b   : > { %s219_s9 = sshll.u32 %s217_s8, 4  ;;  %s221_s11 = sshll.u32 %s212_s10, 4  ;;  %s220_s9 = int_to_ptr.hbm [resolvable:$true] %s219_s9  ;;  %s222_s11 = int_to_ptr.vmem [resolvable:$true] %s221_s11 }
  0x1c   : > { %p1025_p10 = pnand %p683_p7, %p80_p5  ;;  %s209_s13 = scalar_lea.sflag [#allocation6], %s208_s26 }
  0x1d   : > { %s796_s15 = sshra.s32 %s220_s9, 4  ;;  %s803_s28 = scalar_lea.hbm %s1172_s2, 8  ;;  %s797_s15 = int_to_ptr.hbm [resolvable:$true] %s796_s15 }
  0x1e   : > { %s798_s16 = scalar_lea.hbm %s797_s15, 4  ;;  %p800_p11 = pneg %p1025_p10 }
  0x1f   : > { %p799_p2 = scmp.ne.s32.totalorder %s797_s15, %s798_s16  ;;  %p804_p0 = scmp.lt.s32.totalorder %s797_s15, %s1172_s2 }
  0x20   : > { %p805_p5 = scmp.lt.s32.totalorder %s803_s28, %s798_s16 }
  0x21   : > { %p801_p12 = pnand %p800_p11, %p799_p2 }
  0x22   : > { %p806_p7 = por %p805_p5, %p804_p0 }
  0x23   : > { %p802_p13 = pneg %p801_p12 }
  0x25   : > { %p807_p9 = pnand %p806_p7, %p802_p13 }
  0x27   : > { %810 = shalt.err (!%p807_p9)
}
  0x28   : > { %676 = dma.hbm_to_vmem [thread:$0]  (!%p1025_p10), %s220_s9, 64, %s222_s11, %s209_s13  }
  0x29   : > { %230 = sbr.rel (%p988_p8) target bundleno = 376 (0x178), region = 40 }
  0x2e   : > { %871 = dma.done.wait (%p85_p1), [#allocation3], 512  }
  0x2f   : > { %873 = vsyncadd (%p85_p1), [#allocation3], 4294966784  ;;  %s237_s26 = sand.u32 1, %s966_s22   ;;  %s1047_s8 = sand.u32 1, %s892_s19  }
  0x30   : > { %s642_s10 = sshll.u32 %s1047_s8, 2  ;;  %s238_s15 = scalar_lea.sflag [#allocation6], %s237_s26 }
  0x31   : > { %s241_s12 = scalar_lea.vmem [#allocation5], %s642_s10 }
  0x32   : > { %875 = dma.done.wait (%p975_p4), %s238_s15, 64  }
  0x33   : > { %877 = vsyncadd (%p975_p4), %s238_s15, 4294967232 }
  0x34   : > { %879 = dma.done.wait (%p85_p1), [#allocation6], 64  }
  0x35   : > { %881 = vsyncadd (%p85_p1), [#allocation6], 4294967232  ;;  %v275_v0 = vld [vmem:[%s1170_s0] sm:$0x77]  ;;  %v276_v1 = vld [vmem:[%s241_s12] sm:$0xf]  ;;  %v306_v14 = vlaneseq }
  0x36   : > { %279 = vst [vmem:[#allocation1] ss:$2 sm:$0xff] %v275_v0  ;;  %v277_v2 = vunpack.c.l.bf16 %v276_v1  ;;  %vm292_vm0 = vcmask 1042432   ;;  %vm295_vm1 = vcmask 1046528   ;;  %s906_s24 = smov 113   ;;  %s907_s11 = smov 111  }
  0x37   : > { %s908_s13 = smov 112   ;;  %s909_s16 = smov 127   ;;  %v1081_v15 = vand.u32 127, %v306_v14  ;;  %v1083_v16 = vld [vmem:[#allocation2] sm:$0xff]  ;;  %v1085_v17 = vld [vmem:[#allocation2 + $0x8] sm:$0xff]  ;;  %vm446_vm6 = vcmask 1043456  }
  0x38   : > { %s910_s27 = smov 15   ;;  %s911_s30 = smov 1   ;;  %v384_v21 = vperm.slane %v1083_v16, 7  ;;  %v385_v22 = vperm.slane %v1085_v17, 7  ;;  %v372_v27 = vperm.slane %v1083_v16, 6  ;;  %v373_v28 = vperm.slane %v1085_v17, 6 }
  0x39   : > { %s912_s28 = smov 17   ;;  %s913_s6 = smov 16   ;;  %vm381_vm2 = vcmp.lt.s32.totalorder %v1081_v15, 112  ;;  %vm369_vm3 = vcmp.lt.s32.totalorder %v1081_v15, 113  ;;  %vm393_vm4 = vcmp.lt.s32.totalorder %v1081_v15, 111  ;;  %vm357_vm5 = vcmp.lt.s32.totalorder %v1081_v15, 127 }
  0x3a   : > { %v734_v29 = vld [vmem:[#allocation2 + $0x10] ss:$0 sm:$0xff]  ;;  %v735_v30 = vld [vmem:[#allocation2 + $0x18] ss:$0 sm:$0xff]  ;;  %v360_v47 = vperm.slane %v1083_v16, 5  ;;  %v361_v48 = vperm.slane %v1085_v17, 5 }
  0x3b   : > { %vm344_vm7 = vcmp.lt.s32.totalorder %v1081_v15, 1  ;;  %vm332_vm8 = vcmp.lt.s32.totalorder %v1081_v15, 15  ;;  %vm308_vm9 = vcmp.lt.s32.totalorder %v1081_v15, 17  ;;  %vm320_vm10 = vcmp.lt.s32.totalorder %v1081_v15, 16  ;;  %s653_s10 = sshll.u32 %s966_s22, 4  ;;  %s644_s15 = sshll.u32 %s1047_s8, 4 }
  0x3c   : > { %vm486_vm11 = vcmask 588800   ;;  %s536_s9 = scalar_lea.hbm %s1175_s5, %s653_s10 }
  0x3d   : > { %v280_v3 = vld.sshfl [vmem:[#allocation1] sm:$0xff pattern:$0x75316420]  ;;  %v281_v4 = vld.sshfl [vmem:[#allocation1 + $0x8] sm:$0xff pattern:$0x75316420] }
  0x3e   : > { %285 = vst [vmem:[#allocation1] ss:$2 sm:$0xff] %v277_v2 }
  0x45   : > { %v286_v5 = vld.sshfl [vmem:[#allocation1] sm:$0xff pattern:$0x75316420]  ;;  %v287_v6 = vld.sshfl [vmem:[#allocation1 + $0x8] sm:$0xff pattern:$0x75316420] }
  0x46   : > { %v288_v7 = vrot.slane %v286_v5, 5  ;;  %v289_v9 = vrot.slane %v287_v6, 5 }
  0x48   : > { %v293_v8 = vsel %vm292_vm0, %v280_v3, %v288_v7  ;;  %v294_v11 = vsel %vm292_vm0, %v281_v4, %v289_v9  ;;  %v347_v7 = vperm.slane %v1083_v16, 3 }
  0x49   : > { %v1061_v10 = vsel %vm295_vm1, %v293_v8, 0.0  ;;  %v1066_v12 = vsel %vm295_vm1, %v294_v11, 0.0  ;;  %v348_v8 = vperm.slane %v1085_v17, 3  ;;  %v336_v11 = vperm.slane %v1085_v17, 2 }
  0x4a   : > { %365 = vrot.lane.b32.xlu1 %v1061_v10, %s906_s24  ;;  %389 = vrot.lane.b32.xlu0 %v1061_v10, %s907_s11  ;;  %v352_v53 = vpack.c.bf16 %v1066_v12, %v1061_v10 }
  0x4b   : > { %377 = vrot.lane.b32.xlu2 %v1061_v10, %s908_s13 }
  0x4c   : > { %v422_v4 = vunpack.c.l.b16 %v352_v53  ;;  %v423_v5 = vunpack.c.h.b16 %v352_v53 }
  0x52   : > { %367 = vrot.lane.b32.xlu1 %v1066_v12, %s906_s24  ;;  %391 = vrot.lane.b32.xlu0 %v1066_v12, %s907_s11  ;;  %s273_s24 = scalar_lea.vmem [#allocation8], %s644_s15 }
  0x53   : > { %379 = vrot.lane.b32.xlu2 %v1066_v12, %s908_s13  ;;  %s538_s11 = sshll.u32 %s273_s24, 4  ;;  %s540_s13 = sshll.u32 %s536_s9, 4  ;;  %s539_s11 = int_to_ptr.vmem [resolvable:$true] %s538_s11  ;;  %s541_s13 = int_to_ptr.hbm [resolvable:$true] %s540_s13 }
  0x54   : > { %s840_s22 = sshra.s32 %s541_s13, 4  ;;  %s841_s22 = int_to_ptr.hbm [resolvable:$true] %s840_s22 }
  0x55   : > { %p847_p9 = scmp.lt.s32.totalorder %s841_s22, %s1175_s5 }
  0x5a   : > { %355 = vrot.lane.b32.xlu1 %v1066_v12, %s909_s16  ;;  %353 = vrot.lane.b32.xlu0 %v1061_v10, %s909_s16  ;;  %s525_s16 = scalar_lea.sflag [#allocation4], %s1047_s8 }
  0x5b   : > { %328 = vrot.lane.b32.xlu2 %v1061_v10, %s910_s27 }
  0x62   : > { %340 = vrot.lane.b32.xlu1 %v1061_v10, %s911_s30  ;;  %330 = vrot.lane.b32.xlu0 %v1066_v12, %s910_s27  ;;  %s842_s27 = scalar_lea.hbm %s841_s22, 16 }
  0x63   : > { %342 = vrot.lane.b32.xlu2 %v1066_v12, %s911_s30  ;;  %p843_p1 = scmp.ne.s32.totalorder %s841_s22, %s842_s27 }
  0x65   : > { %p844_p4 = pnand %p843_p1, %p1014_p3 }
  0x67   : > { %p845_p8 = pneg %p844_p4 }
  0x6a   : > { %304 = vrot.lane.b32.xlu1 %v1066_v12, %s912_s28  ;;  %302 = vrot.lane.b32.xlu0 %v1061_v10, %s912_s28 }
  0x6b   : > { %316 = vrot.lane.b32.xlu2 %v1061_v10, %s913_s6  ;;  %v335_v10 = vperm.slane %v1083_v16, 2 }
  0x72   : > { %318 = vrot.lane.b32.xlu0 %v1066_v12, %s913_s6  ;;  %s846_s6 = scalar_lea.hbm %s1175_s5, 32 }
  0x73   : > { %p848_p10 = scmp.lt.s32.totalorder %s846_s6, %s842_s27 }
  0x75   : > { %p849_p2 = por %p848_p10, %p847_p9 }
  0x77   : > { %p850_p11 = pnand %p849_p2, %p845_p8 }
  0xa5   : > { %v378_v13 = vpop.permute.xlu2 %377 }
  0xad   : > { %v380_v18 = vpop.permute.xlu2 %379 }
  0xae   : > { %v382_v23 = vsel %vm381_vm2, %v378_v13, %v380_v18  ;;  %v383_v24 = vsel %vm381_vm2, %v380_v18, %v378_v13 }
  0xaf   : > { %v386_v25 = vmul.f32 %v384_v21, %v382_v23  ;;  %v387_v26 = vmul.f32 %v385_v22, %v383_v24  ;;  %v425_v21 = vpack.c.b16 %v423_v5, %v423_v5 }
  0xb1   : > { %v388_v31 = vpack.c.bf16 %v387_v26, %v386_v25  ;;  %v914_v26 = vmov 0  }
  0xb2   : > { %732 = vset.pattern.permute.xlu1 %v914_v26  ;;  %733 = vset.pattern.permute.xlu0 %v914_v26 }
  0xb3   : > { %v437_v45 = vunpack.c.l.b16 %v388_v31  ;;  %v438_v46 = vunpack.c.h.b16 %v388_v31 }
  0xb5   : > { %v329_v43 = vpop.permute.xlu2 %328  ;;  %v439_v58 = vpack.c.b16 %v437_v45, %v437_v45  ;;  %v440_v59 = vpack.c.b16 %v438_v46, %v438_v46 }
  0xbc   : > { %v366_v19 = vpop.permute.xlu1 %365  ;;  %v390_v20 = vpop.permute.xlu0 %389 }
  0xbd   : > { %v343_v13 = vpop.permute.xlu2 %342 }
  0xc4   : > { %v368_v32 = vpop.permute.xlu1 %367  ;;  %v392_v33 = vpop.permute.xlu0 %391 }
  0xc5   : > { %v370_v34 = vsel %vm369_vm3, %v366_v19, %v368_v32  ;;  %v371_v35 = vsel %vm369_vm3, %v368_v32, %v366_v19  ;;  %v394_v36 = vsel %vm393_vm4, %v390_v20, %v392_v33  ;;  %v395_v37 = vsel %vm393_vm4, %v392_v33, %v390_v20  ;;  %v480_v19 = vld [vmem:[%s1174_s4] sm:$0xff] }
  0xc6   : > { %v374_v38 = vmul.f32 %v372_v27, %v370_v34  ;;  %v375_v39 = vmul.f32 %v373_v28, %v371_v35  ;;  %v398_v40 = vmul.f32 %v734_v29, %v394_v36  ;;  %v399_v41 = vmul.f32 %v735_v30, %v395_v37  ;;  %483 = vperm.xlu1 %732, %v480_v19  }
  0xc7   : > { %v424_v20 = vpack.c.b16 %v422_v4, %v422_v4 }
  0xc8   : > { %v376_v42 = vpack.c.bf16 %v375_v39, %v374_v38  ;;  %v400_v44 = vpack.c.bf16 %v399_v41, %v398_v40 }
  0xca   : > { %v442_v49 = vunpack.c.l.b16 %v400_v44  ;;  %v443_v50 = vunpack.c.h.b16 %v400_v44  ;;  %v432_v51 = vunpack.c.l.b16 %v376_v42  ;;  %v433_v52 = vunpack.c.h.b16 %v376_v42 }
  0xcb   : > { %v312_v44 = vperm.slane %v1085_v17, 0 }
  0xcc   : > { %v356_v54 = vpop.permute.xlu1 %355  ;;  %v354_v55 = vpop.permute.xlu0 %353  ;;  %v444_v56 = vpack.c.b16 %v442_v49, %v442_v49  ;;  %v445_v57 = vpack.c.b16 %v443_v50, %v443_v50  ;;  %v434_v62 = vpack.c.b16 %v432_v51, %v432_v51  ;;  %v435_v63 = vpack.c.b16 %v433_v52, %v433_v52 }
  0xcd   : > { %v358_v60 = vsel %vm357_vm5, %v354_v55, %v356_v54  ;;  %v359_v61 = vsel %vm357_vm5, %v356_v54, %v354_v55 }
  0xce   : > { %v362_v0 = vmul.f32 %v360_v47, %v358_v60  ;;  %v363_v1 = vmul.f32 %v361_v48, %v359_v61  ;;  %v491_v2 = vsel %vm446_vm6, %v444_v56, 0  ;;  %v494_v3 = vsel %vm446_vm6, %v445_v57, 0  ;;  %v317_v57 = vpop.permute.xlu2 %316 }
  0xcf   : > { %499 = vmatpush.bf16.msra.mxu0 %v491_v2  ;;  %512 = vmatpush.bf16.msra.mxu1 %v494_v3  ;;  %v473_v9 = vsel %vm446_vm6, %v434_v62, %v439_v58  ;;  %v477_v12 = vsel %vm446_vm6, %v435_v63, %v440_v59  ;;  %v323_v58 = vperm.slane %v1083_v16, 1  ;;  %v324_v59 = vperm.slane %v1085_v17, 1 }
  0xd0   : > { %v364_v6 = vpack.c.bf16 %v363_v1, %v362_v0 }
  0xd2   : > { %v427_v14 = vunpack.c.l.b16 %v364_v6  ;;  %v428_v18 = vunpack.c.h.b16 %v364_v6 }
  0xd3   : > { %500 = vmatpush.bf16.msra.mxu0 %v473_v9  ;;  %513 = vmatpush.bf16.msra.mxu1 %v477_v12 }
  0xd4   : > { %v341_v22 = vpop.permute.xlu1 %340  ;;  %v331_v23 = vpop.permute.xlu0 %330  ;;  %v429_v24 = vpack.c.b16 %v427_v14, %v427_v14  ;;  %v430_v25 = vpack.c.b16 %v428_v18, %v428_v18 }
  0xd5   : > { %v345_v27 = vsel %vm344_vm7, %v341_v22, %v343_v13  ;;  %v346_v28 = vsel %vm344_vm7, %v343_v13, %v341_v22  ;;  %v333_v29 = vsel %vm332_vm8, %v329_v43, %v331_v23  ;;  %v334_v30 = vsel %vm332_vm8, %v331_v23, %v329_v43 }
  0xd6   : > { %v349_v31 = vmul.f32 %v347_v7, %v346_v28  ;;  %v350_v32 = vmul.f32 %v348_v8, %v345_v27  ;;  %v337_v33 = vmul.f32 %v335_v10, %v334_v30  ;;  %v338_v34 = vmul.f32 %v336_v11, %v333_v29  ;;  %v479_v10 = vld [vmem:[#allocation7] sm:$0xf] }
  0xd7   : > { %v465_v35 = vsel %vm446_vm6, %v424_v20, %v429_v24  ;;  %v469_v36 = vsel %vm446_vm6, %v425_v21, %v430_v25  ;;  %v311_v43 = vperm.slane %v1083_v16, 0 }
  0xd8   : > { %v351_v37 = vpack.c.bf16 %v350_v32, %v349_v31  ;;  %v339_v38 = vpack.c.bf16 %v338_v34, %v337_v33  ;;  %501 = vmatpush.bf16.msra.mxu0 %v465_v35  ;;  %514 = vmatpush.bf16.msra.mxu1 %v469_v36 }
  0xda   : > { %v412_v39 = vunpack.c.l.b16 %v339_v38  ;;  %v417_v40 = vunpack.c.l.b16 %v351_v37  ;;  %v413_v41 = vunpack.c.h.b16 %v339_v38  ;;  %v418_v42 = vunpack.c.h.b16 %v351_v37 }
  0xdc   : > { %v305_v45 = vpop.permute.xlu1 %304  ;;  %v303_v46 = vpop.permute.xlu0 %302  ;;  %v414_v47 = vpack.c.b16 %v412_v39, %v412_v39  ;;  %v419_v48 = vpack.c.b16 %v417_v40, %v417_v40  ;;  %v415_v49 = vpack.c.b16 %v413_v41, %v413_v41  ;;  %v420_v50 = vpack.c.b16 %v418_v42, %v418_v42 }
  0xdd   : > { %v309_v51 = vsel %vm308_vm9, %v303_v46, %v305_v45  ;;  %v310_v52 = vsel %vm308_vm9, %v305_v45, %v303_v46 }
  0xde   : > { %v457_v53 = vsel %vm446_vm6, %v414_v47, %v419_v48  ;;  %v461_v54 = vsel %vm446_vm6, %v415_v49, %v420_v50  ;;  %v313_v55 = vmul.f32 %v311_v43, %v310_v52  ;;  %v314_v56 = vmul.f32 %v312_v44, %v309_v51 }
  0xdf   : > { %502 = vmatpush.bf16.msra.mxu0 %v457_v53  ;;  %515 = vmatpush.bf16.msra.mxu1 %v461_v54 }
  0xe0   : > { %v315_v60 = vpack.c.bf16 %v314_v56, %v313_v55 }
  0xe2   : > { %v402_v3 = vunpack.c.l.b16 %v315_v60  ;;  %v403_v4 = vunpack.c.h.b16 %v315_v60 }
  0xe4   : > { %v319_v61 = vpop.permute.xlu0 %318  ;;  %v404_v7 = vpack.c.b16 %v402_v3, %v402_v3  ;;  %v405_v15 = vpack.c.b16 %v403_v4, %v403_v4 }
  0xe5   : > { %v321_v62 = vsel %vm320_vm10, %v317_v57, %v319_v61  ;;  %v322_v63 = vsel %vm320_vm10, %v319_v61, %v317_v57 }
  0xe6   : > { %v325_v0 = vmul.f32 %v323_v58, %v322_v63  ;;  %v326_v1 = vmul.f32 %v324_v59, %v321_v62 }
  0xe8   : > { %v327_v2 = vpack.c.bf16 %v326_v1, %v325_v0 }
  0xea   : > { %v407_v5 = vunpack.c.l.b16 %v327_v2  ;;  %v408_v6 = vunpack.c.h.b16 %v327_v2 }
  0xec   : > { %v409_v8 = vpack.c.b16 %v407_v5, %v407_v5  ;;  %v410_v9 = vpack.c.b16 %v408_v6, %v408_v6 }
  0xee   : > { %v449_v16 = vsel %vm446_vm6, %v404_v7, %v409_v8  ;;  %v453_v17 = vsel %vm446_vm6, %v405_v15, %v410_v9 }
  0xef   : > { %503 = vmatpush.bf16.msra.mxu0 %v449_v16  ;;  %516 = vmatpush.bf16.msra.mxu1 %v453_v17 }
  0xf2   : > { %645 = vmatmul.msk.bf16.vlgmr.msra.gmra.mxu0 %vm486_vm11, %v479_v10  ;;  %646 = vmatmul.msk.bf16.vlgmr.msra.gmra.mxu1 %vm486_vm11, %v479_v10 }
 0x138   : > { %v484_v11 = vpop.permute.xlu1 %483 }
 0x16f   : > { %v505_v12 = vpop.f32.mrf.mxu0  ;;  %v518_v13 = vpop.f32.mrf.mxu1 }
 0x170   : > { %v506_v14 = vadd.f32 %v505_v12, %v484_v11  ;;  %v519_v18 = vadd.f32 %v518_v13, %v484_v11 }
 0x172   : > { %522 = vst [vmem:[%s273_s24] sm:$0xff] %v506_v14 }
 0x173   : > { %523 = vst [vmem:[%s273_s24 + $0x8] sm:$0xff] %v519_v18 }
 0x174   : > { %853 = shalt.err (!%p850_p11)
}
 0x175   : > { %664 = dma.vmem_to_hbm [thread:$0]  (%p1014_p3), %s539_s11, 256, %s541_s13, %s525_s16  }
 0x177   : > { %v507_v19 = vpop.f32.mrf.mxu0  ;;  %v520_v20 = vpop.f32.mrf.mxu1 }
 0x178 PF: > { %s552_s8 = sand.u32 1, %s888_s18   ;;  %p1181_p12 = scmp.ge.s32.totalorder %s900_s21, 2 }
 0x179   : > { %s553_s10 = scalar_lea.sflag [#allocation4], %s552_s8 }
 0x17a   : > { %p678_p13 = pnand %p1181_p12, %p980_p6 }
 0x17c   : > { %p679_p0 = pneg %p678_p13 }
 0x17e   : > { %883 = dma.done.wait (%p679_p0), %s553_s10, 256  }
 0x17f   : > { %885 = vsyncadd (%p679_p0), %s553_s10, 4294967040  ;;  %p19_p3 = scmp.ge.s32.totalorder %s1001_s14, 4   ;;  %s1182_s18 = smov %s892_s19 }
 0x180   : > { %s1183_s19 = smov %s896_s20  ;;  %s1184_s20 = smov %s1010_s17 }
 0x181   : > { %s1185_s21 = smov %s1001_s14  ;;  %21 = sbr.rel (!%p19_p3) target bundleno = 6 (0x6), region = 94 }
 0x186   :  { %559 = vsyncpa [#allocation3], 1 }
 0x187   :  { %561 = vsyncpa [#allocation3 + $0x1], 1 }
 0x188   :  { %562 = vsyncpa [#allocation6], 1 }
 0x189   :  { %564 = vsyncpa [#allocation6 + $0x1], 1 }
 0x18a   :  { %565 = vsyncpa [#allocation4], 1 }
 0x18b   :  { %567 = vsyncpa [#allocation4 + $0x1], 1 }

</bundles_post_ra>
